<compile_context>
chip_gen: v7x
topology: tpu7x:2x2x1
jax: 0.10.0
libtpu: 0.0.40
codegen_flags: <defaults>
</compile_context>

<pallas_src>
import jax
import jax.numpy as jnp
from jax.experimental import pallas as pl
from jax.experimental.pallas import tpu as pltpu


def mlp_kernel(x_ref, w1_ref, b1_ref, w2_ref, b2_ref, w3_ref, b3_ref, o_ref):
    # x_ref: [2, TB] f32 (features on sublanes, batch on lanes).  Cast to bf16
    # in-kernel (VPU, overlapped) so all three dots are single-pass bf16 MXU
    # matmuls with f32 accumulation.
    x = x_ref[...].astype(jnp.bfloat16)

    # layer1: [8,2] @ [2,TB] -> [8,TB]; bias [8,1] broadcasts over lanes; ReLU.
    h1 = jnp.dot(w1_ref[...], x, preferred_element_type=jnp.float32)
    h1 = jnp.maximum(h1 + b1_ref[...], 0.0)

    # layer2: [8,8] @ [8,TB] -> [8,TB]; ReLU.
    h2 = jnp.dot(w2_ref[...], h1.astype(jnp.bfloat16),
                 preferred_element_type=jnp.float32)
    h2 = jnp.maximum(h2 + b2_ref[...], 0.0)

    # layer3: [4,8] @ [8,TB] -> [4,TB] logits (no activation).
    h3 = jnp.dot(w3_ref[...], h2.astype(jnp.bfloat16),
                 preferred_element_type=jnp.float32)
    o_ref[...] = (h3 + b3_ref[...]).astype(o_ref.dtype)   # lane-dense store


def _choose_tile(B, max_tile):
    # Tile must be a multiple of 128 (lane axis of the x/out BlockSpecs).
    tb_cap = max(128, (int(max_tile) // 128) * 128)
    b_pad128 = pl.cdiv(B, 128) * 128
    if b_pad128 >= 2 * 128:
        # Keep >=2 grid steps so dimension_semantics=("parallel",) can split
        # the batch across both v7x TensorCores (harmless elsewhere: one extra
        # ~0.35us grid step).
        return min(tb_cap, pl.cdiv(b_pad128, 2 * 128) * 128)
    return min(tb_cap, b_pad128)


def multiclass_forward_ft(x_ft, params, *, max_tile=32768, out_dtype=jnp.float32):
    """Kernel-native layout: x_ft [2, B] -> logits [4, B].

    Zero wrapper copies when B is a multiple of the chosen batch tile; only x
    and the logits stream HBM<->VMEM, weights stay resident in VMEM.
    """
    (w1, b1), (w2, b2), (w3, b3) = params
    assert x_ft.shape[0] == 2, x_ft.shape
    B = x_ft.shape[1]

    TB = _choose_tile(B, max_tile)
    Bp = pl.cdiv(B, TB) * TB

    x_in = x_ft.astype(jnp.float32)
    if Bp != B:
        # Ragged tail only: pad the (small) input once; padded lanes produce
        # bias-only garbage that is sliced off below.
        x_in = jnp.pad(x_in, ((0, 0), (0, Bp - B)))

    # Weights to bf16 once (single-pass MXU); biases as [out, 1] f32 so they
    # broadcast over the lane (batch) axis in-kernel.
    w1b, w2b, w3b = (w.astype(jnp.bfloat16) for w in (w1, w2, w3))
    b1c, b2c, b3c = (b.astype(jnp.float32).reshape(-1, 1) for b in (b1, b2, b3))

    # Constant block index -> weights/biases resident in VMEM, not re-DMA'd.
    const = lambda shape: pl.BlockSpec(shape, lambda i: (0, 0))

    # Scoped-VMEM budget from the actual tile footprint: x and out blocks both
    # sublane-pad to 8 rows, double-buffered (v5e scoped default is 16 MiB).
    tile_bytes = 8 * TB * 4
    vmem_limit = int(min(max(4 * tile_bytes + (2 << 20), 16 << 20), 48 << 20))

    cost = pl.CostEstimate(
        flops=2 * (2 * 8 + 8 * 8 + 8 * 4) * Bp,
        transcendentals=0,
        bytes_accessed=(2 * 4 + 4 * jnp.dtype(out_dtype).itemsize) * Bp,
    )

    out_ft = pl.pallas_call(
        mlp_kernel,
        out_shape=jax.ShapeDtypeStruct((4, Bp), out_dtype),
        grid=(Bp // TB,),
        in_specs=[
            pl.BlockSpec((2, TB), lambda i: (0, i)),   # x tile streams over batch
            const(w1b.shape), const(b1c.shape),
            const(w2b.shape), const(b2c.shape),
            const(w3b.shape), const(b3c.shape),
        ],
        out_specs=pl.BlockSpec((4, TB), lambda i: (0, i)),
        compiler_params=pltpu.CompilerParams(
            dimension_semantics=("parallel",),          # shard batch across TCs
            vmem_limit_bytes=vmem_limit,
        ),
        cost_estimate=cost,
    )(x_in, w1b, b1c, w2b, b2c, w3b, b3c)

    if Bp != B:
        out_ft = out_ft[:, :B]
    return out_ft


def multiclass_forward(x, params, *, max_tile=32768, out_dtype=jnp.float32):
    """PyTorch-compatible interface: x [B, 2] -> logits [B, 4].

    Compatibility path only: the .T on input/output re-introduces layout
    copies.  Producers/consumers that can use the feature-major layout should
    call `multiclass_forward_ft` directly (zero-copy).
    """
    out_ft = multiclass_forward_ft(x.T, params, max_tile=max_tile,
                                   out_dtype=out_dtype)
    return out_ft.T


def init_params(key):
    """Deterministic init mirroring nn.Linear shapes: weight (out, in), bias (out,)."""
    def linear_init(k, fan_in, fan_out):
        kw, kb = jax.random.split(k)
        bound = 1.0 / jnp.sqrt(fan_in)
        w = jax.random.uniform(kw, (fan_out, fan_in), jnp.float32, -bound, bound)
        b = jax.random.uniform(kb, (fan_out,), jnp.float32, -bound, bound)
        return w, b

    k1, k2, k3 = jax.random.split(key, 3)
    return (
        linear_init(k1, 2, 8),   # layer1: Linear(2, 8)
        linear_init(k2, 8, 8),   # layer2: Linear(8, 8)
        linear_init(k3, 8, 4),   # layer3: Linear(8, 4)
    )


def reference_forward(x, params):
    """f32 reference (module semantics), x [B, 2] -> [B, 4]."""
    (w1, b1), (w2, b2), (w3, b3) = params
    h = jnp.maximum(x @ w1.T + b1, 0.0)
    h = jnp.maximum(h @ w2.T + b2, 0.0)
    return h @ w3.T + b3


def reference_forward_bf16(x, params):
    """Reference mimicking the kernel's bf16-operand / f32-accumulate dots."""
    (w1, b1), (w2, b2), (w3, b3) = params
    c = lambda a: a.astype(jnp.bfloat16)
    h = jnp.maximum(jnp.dot(c(x), c(w1).T, preferred_element_type=jnp.float32) + b1, 0.0)
    h = jnp.maximum(jnp.dot(c(h), c(w2).T, preferred_element_type=jnp.float32) + b2, 0.0)
    return jnp.dot(c(h), c(w3).T, preferred_element_type=jnp.float32) + b3


if __name__ == "__main__":
    key = jax.random.PRNGKey(0)
    kx, kp, kx2 = jax.random.split(key, 3)
    params = init_params(kp)

    # --- Primary (kernel-native, zero-copy) path: [2, B] -> [4, B]. ----------
    B = 512                       # multiple of the chosen tile -> no pad/slice
    x_ft = jax.random.normal(kx, (2, B), jnp.float32)
    out_ft = multiclass_forward_ft(x_ft, params)
    jax.block_until_ready(out_ft)
    assert out_ft.shape == (4, B), out_ft.shape

    ref_bf16 = reference_forward_bf16(x_ft.T, params).T
    ref_f32 = reference_forward(x_ft.T, params).T
    assert jnp.allclose(out_ft, ref_bf16, atol=2e-2, rtol=2e-2), "mismatch vs bf16 reference"
    assert jnp.allclose(out_ft, ref_f32, atol=8e-2, rtol=8e-2), "mismatch vs f32 reference"

    # --- PyTorch-compatible interface ([B,2] -> [B,4]) + ragged/padded grid. --
    B2 = 300
    x2 = jax.random.normal(kx2, (B2, 2), jnp.float32)
    out2 = multiclass_forward(x2, params, max_tile=128)   # multi-step grid + pad/slice path
    jax.block_until_ready(out2)
    assert out2.shape == (B2, 4), out2.shape
    ref2 = reference_forward_bf16(x2, params)
    assert jnp.allclose(out2, ref2, atol=2e-2, rtol=2e-2), "mismatch vs reference (compat path)"

    print("KERNEL_OK")
</pallas_src>

<mosaic_0001>
module attributes {stable_mosaic.version = 11 : i64} {
  func.func @mlp_kernel(%arg0: i32, %arg1: memref<2x256xf32, #tpu.memory_space<vmem>>, %arg2: memref<8x2xbf16, #tpu.memory_space<vmem>>, %arg3: memref<8x1xf32, #tpu.memory_space<vmem>>, %arg4: memref<8x8xbf16, #tpu.memory_space<vmem>>, %arg5: memref<8x1xf32, #tpu.memory_space<vmem>>, %arg6: memref<4x8xbf16, #tpu.memory_space<vmem>>, %arg7: memref<4x1xf32, #tpu.memory_space<vmem>>, %arg8: memref<4x256xf32, #tpu.memory_space<vmem>>) attributes {dimension_semantics = [#tpu.dimension_semantics<parallel>], iteration_bounds = array<i64: 2>, scalar_prefetch = 0 : i64, scratch_operands = 0 : i64, tpu.core_type = #tpu.core_type<tc>, window_params = [{transform_indices = @transform_0, window_bounds = array<i64: 2, 256>}, {pipeline_mode = #tpu.pipeline_mode<synchronous>, transform_indices = @transform_1, window_bounds = array<i64: 8, 2>}, {pipeline_mode = #tpu.pipeline_mode<synchronous>, transform_indices = @transform_2, window_bounds = array<i64: 8, 1>}, {pipeline_mode = #tpu.pipeline_mode<synchronous>, transform_indices = @transform_3, window_bounds = array<i64: 8, 8>}, {pipeline_mode = #tpu.pipeline_mode<synchronous>, transform_indices = @transform_4, window_bounds = array<i64: 8, 1>}, {pipeline_mode = #tpu.pipeline_mode<synchronous>, transform_indices = @transform_5, window_bounds = array<i64: 4, 8>}, {pipeline_mode = #tpu.pipeline_mode<synchronous>, transform_indices = @transform_6, window_bounds = array<i64: 4, 1>}, {transform_indices = @transform_7, window_bounds = array<i64: 4, 256>}]} {
    %c0 = arith.constant 0 : index
    %c0_0 = arith.constant 0 : index
    %0 = vector.load %arg1[%c0, %c0_0] : memref<2x256xf32, #tpu.memory_space<vmem>>, vector<2x256xf32>
    %1 = arith.truncf %0 : vector<2x256xf32> to vector<2x256xbf16>
    %c0_1 = arith.constant 0 : index
    %c0_2 = arith.constant 0 : index
    %2 = vector.load %arg2[%c0_1, %c0_2] : memref<8x2xbf16, #tpu.memory_space<vmem>>, vector<8x2xbf16>
    %cst = arith.constant dense<0.000000e+00> : vector<8x256xf32>
    %3 = tpu.matmul %2, %1, %cst {dimension_numbers = #tpu.dot_dimension_numbers<[1], [0], [0], [1], [0, 0, 1, 1], [], []>} : vector<8x2xbf16>, vector<2x256xbf16>, vector<8x256xf32> -> vector<8x256xf32>
    %c0_3 = arith.constant 0 : index
    %c0_4 = arith.constant 0 : index
    %4 = vector.load %arg3[%c0_3, %c0_4] : memref<8x1xf32, #tpu.memory_space<vmem>>, vector<8x1xf32>
    %5 = vector.broadcast %4 : vector<8x1xf32> to vector<8x256xf32>
    %6 = arith.addf %3, %5 : vector<8x256xf32>
    %cst_5 = arith.constant 0.000000e+00 : f32
    %7 = vector.broadcast %cst_5 : f32 to vector<8x256xf32>
    %8 = arith.maximumf %6, %7 : vector<8x256xf32>
    %c0_6 = arith.constant 0 : index
    %c0_7 = arith.constant 0 : index
    %9 = vector.load %arg4[%c0_6, %c0_7] : memref<8x8xbf16, #tpu.memory_space<vmem>>, vector<8x8xbf16>
    %10 = arith.truncf %8 : vector<8x256xf32> to vector<8x256xbf16>
    %cst_8 = arith.constant dense<0.000000e+00> : vector<8x256xf32>
    %11 = tpu.matmul %9, %10, %cst_8 {dimension_numbers = #tpu.dot_dimension_numbers<[1], [0], [0], [1], [0, 0, 1, 1], [], []>} : vector<8x8xbf16>, vector<8x256xbf16>, vector<8x256xf32> -> vector<8x256xf32>
    %c0_9 = arith.constant 0 : index
    %c0_10 = arith.constant 0 : index
    %12 = vector.load %arg5[%c0_9, %c0_10] : memref<8x1xf32, #tpu.memory_space<vmem>>, vector<8x1xf32>
    %13 = vector.broadcast %12 : vector<8x1xf32> to vector<8x256xf32>
    %14 = arith.addf %11, %13 : vector<8x256xf32>
    %cst_11 = arith.constant 0.000000e+00 : f32
    %15 = vector.broadcast %cst_11 : f32 to vector<8x256xf32>
    %16 = arith.maximumf %14, %15 : vector<8x256xf32>
    %c0_12 = arith.constant 0 : index
    %c0_13 = arith.constant 0 : index
    %17 = vector.load %arg6[%c0_12, %c0_13] : memref<4x8xbf16, #tpu.memory_space<vmem>>, vector<4x8xbf16>
    %18 = arith.truncf %16 : vector<8x256xf32> to vector<8x256xbf16>
    %cst_14 = arith.constant dense<0.000000e+00> : vector<4x256xf32>
    %19 = tpu.matmul %17, %18, %cst_14 {dimension_numbers = #tpu.dot_dimension_numbers<[1], [0], [0], [1], [0, 0, 1, 1], [], []>} : vector<4x8xbf16>, vector<8x256xbf16>, vector<4x256xf32> -> vector<4x256xf32>
    %c0_15 = arith.constant 0 : index
    %c0_16 = arith.constant 0 : index
    %20 = vector.load %arg7[%c0_15, %c0_16] : memref<4x1xf32, #tpu.memory_space<vmem>>, vector<4x1xf32>
    %21 = vector.broadcast %20 : vector<4x1xf32> to vector<4x256xf32>
    %22 = arith.addf %19, %21 : vector<4x256xf32>
    %c0_17 = arith.constant 0 : index
    %c0_18 = arith.constant 0 : index
    %23 = vector.load %arg8[%c0_17, %c0_18] : memref<4x256xf32, #tpu.memory_space<vmem>>, vector<4x256xf32>
    tpu.vector_store %arg8[%c0_17, %c0_18], %22 {strides = array<i32>} : memref<4x256xf32, #tpu.memory_space<vmem>>, vector<4x256xf32>,
    return
  }
  func.func @transform_0(%arg0: i32) -> (i32, i32) {
    %c0_i32 = arith.constant 0 : i32
    %c0_i32_0 = arith.constant 0 : i32
    return %c0_i32, %arg0 : i32, i32
  }
  func.func @transform_1(%arg0: i32) -> (i32, i32) {
    %c0_i32 = arith.constant 0 : i32
    %c0_i32_0 = arith.constant 0 : i32
    %c0_i32_1 = arith.constant 0 : i32
    return %c0_i32, %c0_i32_0 : i32, i32
  }
  func.func @transform_2(%arg0: i32) -> (i32, i32) {
    %c0_i32 = arith.constant 0 : i32
    %c0_i32_0 = arith.constant 0 : i32
    %c0_i32_1 = arith.constant 0 : i32
    return %c0_i32, %c0_i32_0 : i32, i32
  }
  func.func @transform_3(%arg0: i32) -> (i32, i32) {
    %c0_i32 = arith.constant 0 : i32
    %c0_i32_0 = arith.constant 0 : i32
    %c0_i32_1 = arith.constant 0 : i32
    return %c0_i32, %c0_i32_0 : i32, i32
  }
  func.func @transform_4(%arg0: i32) -> (i32, i32) {
    %c0_i32 = arith.constant 0 : i32
    %c0_i32_0 = arith.constant 0 : i32
    %c0_i32_1 = arith.constant 0 : i32
    return %c0_i32, %c0_i32_0 : i32, i32
  }
  func.func @transform_5(%arg0: i32) -> (i32, i32) {
    %c0_i32 = arith.constant 0 : i32
    %c0_i32_0 = arith.constant 0 : i32
    %c0_i32_1 = arith.constant 0 : i32
    return %c0_i32, %c0_i32_0 : i32, i32
  }
  func.func @transform_6(%arg0: i32) -> (i32, i32) {
    %c0_i32 = arith.constant 0 : i32
    %c0_i32_0 = arith.constant 0 : i32
    %c0_i32_1 = arith.constant 0 : i32
    return %c0_i32, %c0_i32_0 : i32, i32
  }
  func.func @transform_7(%arg0: i32) -> (i32, i32) {
    %c0_i32 = arith.constant 0 : i32
    %c0_i32_0 = arith.constant 0 : i32
    return %c0_i32, %arg0 : i32, i32
  }
}

</mosaic_0001>

<bundles_post_ra>
// kernel: tpu_custom_call.1
= control target key start
LH: loop header
LB: loop body
LE: loop exit
PB: predicated region body
PF: predicated region fallthrough
CT: control target
= control target key end

     0   :  { %12 = vsyncpa [#allocation3], 0  ;;  %s848_s0 = inlined_call_operand.vmem [shape: f32[2,512], index: 0, kind: input, shape index: {}]   ;;  %s849_s1 = inlined_call_operand.vmem [shape: bf16[8,2], index: 1, kind: input, shape index: {}]   ;;  %s850_s2 = inlined_call_operand.vmem [shape: f32[8,1], index: 2, kind: input, shape index: {}]   ;;  %s851_s3 = inlined_call_operand.vmem [shape: bf16[8,8], index: 3, kind: input, shape index: {}]   ;;  %s852_s4 = inlined_call_operand.vmem [shape: f32[8,1], index: 4, kind: input, shape index: {}]   ;;  %s853_s5 = inlined_call_operand.vmem [shape: bf16[4,8], index: 5, kind: input, shape index: {}]   ;;  %s854_s6 = inlined_call_operand.vmem [shape: f32[4,1], index: 6, kind: input, shape index: {}]   ;;  %s855_s7 = inlined_call_operand.hbm [shape: f32[4,512], index: 7, kind: output, shape index: {}]  }
   0x1   :  { %14 = vsyncpa [#allocation3 + $0x1], 0  ;;  %s725_s24 = smov 0   ;;  %s727_s25 = smov 0  }
   0x2   :  { %s729_s26 = smov 0   ;;  %s731_s27 = smov 0  }
   0x3 LB: > { %s746_s28 = sadd.s32 4294967295, %s681_s27   ;;  %s557_s29 = sadd.s32 4294967294, %s681_s27   ;;  %s681_s27 = sphi %s731_s27, %s861_s27   ;;  %s677_s26 = sphi %s729_s26, %s860_s26   ;;  %s673_s25 = sphi %s727_s25, %s859_s25   ;;  %s669_s24 = sphi %s725_s24, %s858_s24  }
   0x4   : > { %s750_s30 = sadd.s32 1, %s681_s27   ;;  %s179_s8 = sadd.s32 1, %s677_s26 }
   0x5   : > { %s176_s9 = ssub.s32 %s681_s27, %s750_s30  ;;  %p189_p0 = scmp.ne.s32.totalorder %s677_s26, %s673_s25 }
   0x6   : > { %p177_p1 = scmp.eq.s32.totalorder %s176_s9, 0  ;;  %p190_p2 = scmp.eq.s32.totalorder %s746_s28, 1 }
   0x7   : > { %p195_p3 = scmp.ne.s32.totalorder %s673_s25, %s669_s24  ;;  %p196_p4 = scmp.eq.s32.totalorder %s557_s29, 1 }
   0x8   : > { %s761_s10 = scalar_select %p177_p1, %s677_s26, %s179_s8  }
   0x9   : > { %p763_p5 = por %p190_p2, %p189_p0  ;;  %p767_p6 = por %p196_p4, %p195_p3 }
   0xa   : > { %p560_p7 = scmp.ge.s32.totalorder %s681_s27, 1  ;;  %p241_p8 = scmp.lt.s32.totalorder %s681_s27, 3 }
   0xc   : > { %p242_p9 = pnand %p560_p7, %p241_p8 }
   0xd   : > { %s562_s13 = sshll.u32 (!%p242_p9), %s746_s28, 1  ;;  %v683_v0 = vmov (!%p242_p9), 0   ;;  %v296_v1 = vld [vmem:[%s850_s2] sm:$0xff] (!%p242_p9)  ;;  %vm306_vm0 = vcmask (!%p242_p9), 1040384   ;;  %vm302_vm1 = vcmask (!%p242_p9), 15360   ;;  %vm369_vm2 = vcmask (!%p242_p9), 1043456  }
   0xe   : > { %245 = sbr.rel (%p242_p9) target bundleno = 710 (0x2c6), region = 48  ;;  %p274_p10 = scmp.lt.s32.totalorder (!%p242_p9), %s562_s13, 3  ;;  %345 = vmatprep.mubr.bf16.mxu0 (!%p242_p9), %v683_v0  ;;  %617 = vset.pattern.permute.xlu0 (!%p242_p9), %v683_v0  ;;  %v359_v2 = vld [vmem:[%s852_s4] sm:$0xff] (!%p242_p9)  ;;  %vm365_vm3 = vcmask (!%p242_p9), 64512  }
   0xf   : > { %299 = vperm.xlu0 (!%p242_p9), %617, %v296_v1   ;;  %408 = vmatprep.mubr.bf16.mxu1 (!%p242_p9), %v683_v0  ;;  %v295_v8 = vld [vmem:[%s849_s1] sm:$0xf] (!%p242_p9)  ;;  %s270_s16 = sand.u32 (!%p242_p9), 1, %s673_s25  }
  0x10   : > { %618 = vset.pattern.permute.xlu1 (!%p242_p9), %v683_v0  ;;  %v356_v21 = vld [vmem:[%s851_s3] sm:$0xf] (!%p242_p9)  ;;  %s561_s17 = sshll.u32 (!%p242_p9), %s270_s16, 3  ;;  %s484_s29 = scalar_lea.sflag (!%p242_p9), [#allocation3], %s270_s16 }
  0x11   : > { %v422_v22 = vld [vmem:[%s854_s6] sm:$0xf] (!%p242_p9)  ;;  %s272_s19 = scalar_lea.vmem (!%p242_p9), [#allocation2], %s561_s17 }
  0x12   : > { %425 = vperm.xlu1 (!%p242_p9), %618, %v422_v22   ;;  %v419_v35 = vld [vmem:[%s853_s5] sm:$0x3] (!%p242_p9)  ;;  %s498_s20 = sshll.u32 (!%p242_p9), %s272_s19, 4  ;;  %s808_s20 = int_to_ptr.vmem [resolvable:$true] %s498_s20 }
  0x13   : > { %362 = vperm.xlu0 (!%p242_p9), %617, %v359_v2   ;;  %s619_s8 = scalar_lea.vmem (!%p242_p9), %s808_s20, 128 }
  0x14   : > { %p620_p11 = scmp.ne.s32.totalorder (!%p242_p9), %s808_s20, %s619_s8 }
  0x15   : > { %s863_s13 = smov (!%p274_p10, %s562_s13), 3 }
  0x16   : > { %s563_s18 = sshll.u32 %s863_s13, 1  ;;  %p621_p12 = pnand %p620_p11, %p763_p5 }
  0x17   : > { %s277_s21 = scalar_lea.vmem %s848_s0, %s563_s18  ;;  %s576_s18 = sshll.u32 %s746_s28, 7 }
  0x18   : > { %v564_v3 = vld.sshfl [vmem:[%s277_s21] sm:$0x33 pattern:$0x76325410]  ;;  %s806_s23 = scalar_lea.hbm %s855_s7, %s576_s18  ;;  %p622_p13 = pneg %p621_p12 }
  0x19   : > { %v290_v4 = vcombine.high %v564_v3, %v564_v3  ;;  %v293_v5 = vpack.c.bf16 %v564_v3, %v564_v3  ;;  %s684_s28 = smov [#allocation2]  }
  0x1a   : > { %s623_s9 = sshll.u32 %s684_s28, 4  ;;  %s624_s9 = int_to_ptr.vmem [resolvable:$false] %s623_s9 }
  0x1b   : > { %v294_v6 = vpack.c.bf16 %v290_v4, %v290_v4  ;;  %v308_v7 = vsel %vm306_vm0, %v293_v5, 0  ;;  %s625_s13 = scalar_lea.vmem %s624_s9, 256  ;;  %p626_p0 = scmp.lt.s32.totalorder %s808_s20, %s624_s9 }
  0x1c   : > { %p627_p1 = scmp.lt.s32.totalorder %s625_s13, %s619_s8 }
  0x1d   : > { %565 = vmatprep.subr.msk.bf16.mxu0 %vm306_vm0, %v294_v6 }
  0x1e   : > { %314 = vmatpush1.bf16.msra.mxu0 %v308_v7  ;;  %p628_p2 = por %p627_p1, %p626_p0 }
  0x20   : > { %p629_p3 = pnand %p628_p2, %p622_p13 }
  0x21   : > { %566 = vmatmul.mubr.msk.bf16.vlgmr.msra.gmra.mrb[0].mxu0 %vm302_vm1, %v295_v8 }
  0x22   : > { %469 = vmatprep.mubr.bf16.mxu0 %v683_v0 }
  0x8e   : > { %v300_v9 = vpop.permute.xlu0 %299 }
  0x91   : > { %v426_v36 = vpop.permute.xlu1 %425 }
  0x92   : > { %v363_v23 = vpop.permute.xlu0 %362 }
  0xf4   : > { %v347_v10 = vpop.f32.mrb[0].mxu0 }
  0xf5   : > { %v348_v11 = vadd.f32 %v347_v10, %v300_v9  ;;  %v349_v12 = vpop.f32.mrb[1].mxu0 }
  0xf6   : > { %v350_v13 = vadd.f32 %v349_v12, %v300_v9  ;;  %v351_v14 = vpop.f32.mrb[2].mxu0 }
  0xf7   : > { %v354_v15 = vmax.f32 %v348_v11, 0.0  ;;  %v352_v16 = vpop.f32.mrb[3].mxu0 }
  0xf8   : > { %v355_v17 = vmax.f32 %v350_v13, 0.0 }
  0xf9   : > { %v357_v18 = vpack.c.bf16 %v354_v15, %v354_v15 }
  0xfa   : > { %v358_v19 = vpack.c.bf16 %v355_v17, %v355_v17 }
  0xfb   : > { %v371_v20 = vsel %vm369_vm2, %v357_v18, 0 }
  0xfc   : > { %567 = vmatprep.subr.msk.bf16.mxu1 %vm369_vm2, %v358_v19 }
  0xfd   : > { %377 = vmatpush1.bf16.msra.mxu1 %v371_v20 }
 0x100   : > { %568 = vmatmul.mubr.msk.bf16.vlgmr.msra.gmra.mrb[0].mxu1 %vm365_vm3, %v356_v21 }
 0x1d3   : > { %v410_v24 = vpop.f32.mrb[0].mxu1 }
 0x1d4   : > { %v411_v25 = vadd.f32 %v410_v24, %v363_v23  ;;  %v412_v26 = vpop.f32.mrb[1].mxu1 }
 0x1d5   : > { %v413_v27 = vadd.f32 %v412_v26, %v363_v23  ;;  %v414_v28 = vpop.f32.mrb[2].mxu1 }
 0x1d6   : > { %v417_v29 = vmax.f32 %v411_v25, 0.0  ;;  %v415_v30 = vpop.f32.mrb[3].mxu1 }
 0x1d7   : > { %v418_v31 = vmax.f32 %v413_v27, 0.0 }
 0x1d8   : > { %v420_v32 = vpack.c.bf16 %v417_v29, %v417_v29 }
 0x1d9   : > { %v421_v33 = vpack.c.bf16 %v418_v31, %v418_v31 }
 0x1da   : > { %v432_v34 = vsel %vm369_vm2, %v420_v32, 0 }
 0x1db   : > { %569 = vmatprep.subr.msk.bf16.mxu0 %vm369_vm2, %v421_v33 }
 0x1dc   : > { %438 = vmatpush1.bf16.msra.mxu0 %v432_v34 }
 0x1df   : > { %570 = vmatmul.mubr.msk.bf16.vlgmr.msra.gmra.mrb[4].mxu0 %vm365_vm3, %v419_v35 }
 0x2b2   : > { %v471_v37 = vpop.f32.mrb[4].mxu0 }
 0x2b3   : > { %v473_v38 = vpop.f32.mrb[5].mxu0  ;;  %v472_v39 = vadd.f32 %v471_v37, %v426_v36 }
 0x2b4   : > { %v475_v40 = vpop.f32.mrb[6].mxu0  ;;  %v474_v41 = vadd.f32 %v473_v38, %v426_v36 }
 0x2b5   : > { %v476_v42 = vpop.f32.mrb[7].mxu0 }
 0x2b6   : > { %v480_v43 = vcombine.low %v472_v39, %v474_v41 }
 0x2b8   : > { %482 = vst [vmem:[%s272_s19] sm:$0xff] %v480_v43 }
 0x2b9   : > { %632 = shalt.err (!%p629_p3)
}
 0x2ba   : > { %s633_s14 = scalar_lea.hbm %s806_s23, 128  ;;  %s637_s17 = scalar_lea.hbm %s855_s7, 256 }
 0x2bb   : > { %p634_p4 = scmp.ne.s32.totalorder %s806_s23, %s633_s14  ;;  %p638_p9 = scmp.lt.u32.totalorder %s806_s23, %s855_s7 }
 0x2bc   : > { %p639_p10 = scmp.lt.u32.totalorder %s637_s17, %s633_s14  ;;  %p641_p12 = scmp.lt.u32.totalorder %s633_s14, %s806_s23 }
 0x2bd   : > { %p635_p7 = pnand %p634_p4, %p763_p5 }
 0x2be   : > { %p640_p11 = por %p639_p10, %p638_p9 }
 0x2bf   : > { %p636_p8 = pneg %p635_p7 }
 0x2c0   : > { %p642_p13 = por %p641_p12, %p640_p11 }
 0x2c2   : > { %p643_p0 = pnand %p642_p13, %p636_p8 }
 0x2c4   : > { %646 = shalt.err (!%p643_p0)
}
 0x2c5   : > { %577 = dma.vmem_to_hbm [thread:$0]  (%p763_p5), %s808_s20, 128, %s806_s23, %s484_s29  }
 0x2c6 PF: > { %p583_p1 = scmp.ge.s32.totalorder %s681_s27, 2  ;;  %s510_s21 = sand.u32 1, %s669_s24  }
 0x2c7   : > { %s511_s22 = scalar_lea.sflag [#allocation3], %s510_s21 }
 0x2c8   : > { %p580_p2 = pnand %p583_p1, %p767_p6 }
 0x2ca   : > { %664 = dma.done.wait (!%p580_p2), %s511_s22, 128  }
 0x2cb   : > { %666 = vsyncadd (!%p580_p2), %s511_s22, 4294967168  ;;  %p17_p3 = scmp.ge.s32.totalorder %s750_s30, 4   ;;  %s858_s24 = smov %s673_s25 }
 0x2cc   : > { %s859_s25 = smov %s677_s26  ;;  %s860_s26 = smov %s761_s10 }
 0x2cd   : > { %s861_s27 = smov %s750_s30  ;;  %19 = sbr.rel (!%p17_p3) target bundleno = 3 (0x3), region = 83 }
 0x2d4   :  { %516 = vsyncpa [#allocation3], 1 }
 0x2d5   :  { %518 = vsyncpa [#allocation3 + $0x1], 1 }

</bundles_post_ra>
